<compile_context>
chip_gen: v6e
topology: v6e:2x2x1
jax: 0.10.0
libtpu: 0.0.40
codegen_flags: <defaults>
</compile_context>

<pallas_src>
import functools
import math

import jax
import jax.numpy as jnp
from jax.experimental import pallas as pl
from jax.experimental.pallas import tpu as pltpu


def _gelu_exact(x):
    # PyTorch nn.GELU() default is the exact erf-based formulation.
    return 0.5 * x * (1.0 + jax.lax.erf(x * (1.0 / math.sqrt(2.0))))


def _encoder_kernel(x_ref, wih_ref, whh_ref, b_ref, wfc_ref, bfc_ref, out_ref,
                    *, seq_len, batch, hidden_size):
    S, B, H = seq_len, batch, hidden_size

    # Hoisted input projection for all timesteps: one (S*B, D) @ (D, 4H) matmul,
    # bias broadcast exactly once.  Gate column order matches PyTorch: i, f, g, o.
    xg = (jnp.dot(x_ref[...], wih_ref[...], preferred_element_type=jnp.float32)
          + b_ref[...])                       # (S*B, 4H)
    whh = whh_ref[...]                        # (H, 4H)

    h = jnp.zeros((B, H), jnp.float32)
    c = jnp.zeros((B, H), jnp.float32)
    hs = []

    # Time recurrence: fully unrolled (S is static); B is a multiple of 8, so every
    # xg row slice below is sublane-aligned (no masked extracts).
    for t in range(S):
        gates = xg[t * B:(t + 1) * B, :] + jnp.dot(
            h, whh, preferred_element_type=jnp.float32)        # (B, 4H)

        # Full-width activations (EUP slot has slack), then static lane slices.
        sig = jax.nn.sigmoid(gates)
        th = jnp.tanh(gates)
        i_g = sig[:, 0 * H:1 * H]
        f_g = sig[:, 1 * H:2 * H]
        g_g = th[:, 2 * H:3 * H]
        o_g = sig[:, 3 * H:4 * H]

        c = f_g * c + i_g * g_g
        h = o_g * jnp.tanh(c)
        hs.append(h)                          # stays in vregs — no VMEM round-trip

    # FC head on all timesteps at once: GELU -> Linear -> GELU -> L2 normalize (dim=-1).
    hall = jnp.concatenate(hs, axis=0)                                      # (S*B, H)
    y = _gelu_exact(hall)
    y = jnp.dot(y, wfc_ref[...], preferred_element_type=jnp.float32) + bfc_ref[...]
    y = _gelu_exact(y)                                                      # (S*B, O)

    sumsq = jnp.sum(y * y, axis=-1, keepdims=True)
    # rsqrt(max(sumsq, eps^2)) == 1 / max(||y||, eps) with eps = 1e-12 (PyTorch default).
    inv = jax.lax.rsqrt(jnp.maximum(sumsq, 1e-24))
    out_ref[...] = (y * inv).astype(out_ref.dtype)


def image_encoder3_pallas(x, w_ih, w_hh, b_ih, b_hh, w_fc, b_fc):
    """x: (S, B, D) float32. Weights in PyTorch layout:
       w_ih (4H, D), w_hh (4H, H), b_ih (4H,), b_hh (4H,), w_fc (O, H), b_fc (O,)."""
    S, B, D = x.shape
    H4 = w_ih.shape[0]
    H = H4 // 4
    O = w_fc.shape[0]

    # Pad batch to a multiple of 8 (sublane alignment).  Padded rows are independent
    # LSTM lanes and are discarded after the call.
    Bp = ((B + 7) // 8) * 8
    if Bp != B:
        x = jnp.pad(x, ((0, 0), (0, Bp - B), (0, 0)))

    # Pre-transpose so the kernel does row-major (rows, D) @ (D, cols) matmuls.
    wih_t = jnp.transpose(w_ih)                 # (D, 4H)
    whh_t = jnp.transpose(w_hh)                 # (H, 4H)
    b = (b_ih + b_hh).reshape(1, 4 * H)         # (1, 4H)
    wfc_t = jnp.transpose(w_fc)                 # (H, O)
    bfc = b_fc.reshape(1, O)                    # (1, O)
    x2 = x.reshape(S * Bp, D)                   # flatten time into rows (free reshape)

    kernel = functools.partial(_encoder_kernel, seq_len=S, batch=Bp, hidden_size=H)
    vmem_spec = pl.BlockSpec(memory_space=pltpu.MemorySpace.VMEM)

    out2 = pl.pallas_call(
        kernel,
        out_shape=jax.ShapeDtypeStruct((S * Bp, O), x.dtype),
        in_specs=[vmem_spec] * 6,
        out_specs=vmem_spec,
    )(x2, wih_t, whh_t, b, wfc_t, bfc)

    # TODO(synk): for large batched workloads on v7x, add a "parallel" grid axis over batch
    # chunks (dimension_semantics) to use both TensorCores; unnecessary at these sizes.
    return out2.reshape(S, Bp, O)[:, :B, :]


def image_encoder3_ref(x, w_ih, w_hh, b_ih, b_hh, w_fc, b_fc):
    """Pure-JAX reference mirroring the PyTorch module."""
    S, B, D = x.shape
    H = w_hh.shape[1]

    def step(carry, x_t):
        h, c = carry
        gates = x_t @ w_ih.T + b_ih + h @ w_hh.T + b_hh
        i_g = jax.nn.sigmoid(gates[:, 0 * H:1 * H])
        f_g = jax.nn.sigmoid(gates[:, 1 * H:2 * H])
        g_g = jnp.tanh(gates[:, 2 * H:3 * H])
        o_g = jax.nn.sigmoid(gates[:, 3 * H:4 * H])
        c_n = f_g * c + i_g * g_g
        h_n = o_g * jnp.tanh(c_n)
        return (h_n, c_n), h_n

    h0 = jnp.zeros((B, H), jnp.float32)
    _, hs = jax.lax.scan(step, (h0, h0), x)
    y = _gelu_exact(hs)
    y = y @ w_fc.T + b_fc
    y = _gelu_exact(y)
    norm = jnp.sqrt(jnp.sum(y * y, axis=-1, keepdims=True))
    return y / jnp.maximum(norm, 1e-12)


if __name__ == "__main__":
    # Small, module-consistent shapes: seq=8, batch=4, input=hidden=output=32.
    # (batch=4 deliberately exercises the pad-to-8 path in the wrapper.)
    S, B, D, H, O = 8, 4, 32, 32, 32

    key = jax.random.PRNGKey(0)
    ks = jax.random.split(key, 7)
    scale = 1.0 / math.sqrt(H)
    x    = jax.random.normal(ks[0], (S, B, D), jnp.float32)
    w_ih = jax.random.uniform(ks[1], (4 * H, D), jnp.float32, -scale, scale)
    w_hh = jax.random.uniform(ks[2], (4 * H, H), jnp.float32, -scale, scale)
    b_ih = jax.random.uniform(ks[3], (4 * H,), jnp.float32, -scale, scale)
    b_hh = jax.random.uniform(ks[4], (4 * H,), jnp.float32, -scale, scale)
    w_fc = jax.random.uniform(ks[5], (O, H), jnp.float32, -scale, scale)
    b_fc = jax.random.uniform(ks[6], (O,), jnp.float32, -scale, scale)

    out = image_encoder3_pallas(x, w_ih, w_hh, b_ih, b_hh, w_fc, b_fc)
    out = jax.block_until_ready(out)

    ref = image_encoder3_ref(x, w_ih, w_hh, b_ih, b_hh, w_fc, b_fc)
    assert out.shape == (S, B, O)
    assert jnp.allclose(out, ref, atol=1e-5, rtol=1e-5)

    print("KERNEL_OK")
</pallas_src>

<mosaic_0001>
module attributes {stable_mosaic.version = 11 : i64} {
  func.func @_encoder_kernel(%arg0: memref<64x32xf32, #tpu.memory_space<vmem>>, %arg1: memref<32x128xf32, #tpu.memory_space<vmem>>, %arg2: memref<32x128xf32, #tpu.memory_space<vmem>>, %arg3: memref<1x128xf32, #tpu.memory_space<vmem>>, %arg4: memref<32x32xf32, #tpu.memory_space<vmem>>, %arg5: memref<1x32xf32, #tpu.memory_space<vmem>>, %arg6: memref<64x32xf32, #tpu.memory_space<vmem>>) attributes {dimension_semantics = [], scalar_prefetch = 0 : i64, scratch_operands = 0 : i64, tpu.core_type = #tpu.core_type<tc>} {
    %c0 = arith.constant 0 : index
    %c0_0 = arith.constant 0 : index
    %0 = vector.load %arg0[%c0, %c0_0] : memref<64x32xf32, #tpu.memory_space<vmem>>, vector<64x32xf32>
    %c0_1 = arith.constant 0 : index
    %c0_2 = arith.constant 0 : index
    %1 = vector.load %arg1[%c0_1, %c0_2] : memref<32x128xf32, #tpu.memory_space<vmem>>, vector<32x128xf32>
    %cst = arith.constant dense<0.000000e+00> : vector<64x128xf32>
    %2 = tpu.matmul %0, %1, %cst {dimension_numbers = #tpu.dot_dimension_numbers<[1], [0], [0], [1], [0, 0, 1, 1], [], []>} : vector<64x32xf32>, vector<32x128xf32>, vector<64x128xf32> -> vector<64x128xf32>
    %c0_3 = arith.constant 0 : index
    %c0_4 = arith.constant 0 : index
    %3 = vector.load %arg3[%c0_3, %c0_4] : memref<1x128xf32, #tpu.memory_space<vmem>>, vector<1x128xf32>
    %4 = vector.broadcast %3 : vector<1x128xf32> to vector<64x128xf32>
    %5 = arith.addf %2, %4 : vector<64x128xf32>
    %c0_5 = arith.constant 0 : index
    %c0_6 = arith.constant 0 : index
    %6 = vector.load %arg2[%c0_5, %c0_6] : memref<32x128xf32, #tpu.memory_space<vmem>>, vector<32x128xf32>
    %cst_7 = arith.constant 0.000000e+00 : f32
    %7 = vector.broadcast %cst_7 : f32 to vector<8x32xf32>
    %cst_8 = arith.constant 0.000000e+00 : f32
    %8 = vector.broadcast %cst_8 : f32 to vector<8x32xf32>
    %9 = vector.extract_strided_slice %5 {offsets = [0, 0], sizes = [8, 128], strides = [1, 1]} : vector<64x128xf32> to vector<8x128xf32>
    %cst_9 = arith.constant dense<0.000000e+00> : vector<8x128xf32>
    %10 = tpu.matmul %7, %6, %cst_9 {dimension_numbers = #tpu.dot_dimension_numbers<[1], [0], [0], [1], [0, 0, 1, 1], [], []>} : vector<8x32xf32>, vector<32x128xf32>, vector<8x128xf32> -> vector<8x128xf32>
    %11 = arith.addf %9, %10 : vector<8x128xf32>
    %12 = arith.negf %11 : vector<8x128xf32>
    %13 = math.exp %12 : vector<8x128xf32>
    %cst_10 = arith.constant 1.000000e+00 : f32
    %14 = vector.broadcast %cst_10 : f32 to vector<8x128xf32>
    %15 = arith.addf %14, %13 : vector<8x128xf32>
    %16 = arith.divf %14, %15 : vector<8x128xf32>
    %17 = math.tanh %11 : vector<8x128xf32>
    %18 = vector.extract_strided_slice %16 {offsets = [0, 0], sizes = [8, 32], strides = [1, 1]} : vector<8x128xf32> to vector<8x32xf32>
    %19 = vector.extract_strided_slice %16 {offsets = [0, 32], sizes = [8, 32], strides = [1, 1]} : vector<8x128xf32> to vector<8x32xf32>
    %20 = vector.extract_strided_slice %17 {offsets = [0, 64], sizes = [8, 32], strides = [1, 1]} : vector<8x128xf32> to vector<8x32xf32>
    %21 = vector.extract_strided_slice %16 {offsets = [0, 96], sizes = [8, 32], strides = [1, 1]} : vector<8x128xf32> to vector<8x32xf32>
    %22 = arith.mulf %19, %8 : vector<8x32xf32>
    %23 = arith.mulf %18, %20 : vector<8x32xf32>
    %24 = arith.addf %22, %23 : vector<8x32xf32>
    %25 = math.tanh %24 : vector<8x32xf32>
    %26 = arith.mulf %21, %25 : vector<8x32xf32>
    %27 = vector.extract_strided_slice %5 {offsets = [8, 0], sizes = [8, 128], strides = [1, 1]} : vector<64x128xf32> to vector<8x128xf32>
    %cst_11 = arith.constant dense<0.000000e+00> : vector<8x128xf32>
    %28 = tpu.matmul %26, %6, %cst_11 {dimension_numbers = #tpu.dot_dimension_numbers<[1], [0], [0], [1], [0, 0, 1, 1], [], []>} : vector<8x32xf32>, vector<32x128xf32>, vector<8x128xf32> -> vector<8x128xf32>
    %29 = arith.addf %27, %28 : vector<8x128xf32>
    %30 = arith.negf %29 : vector<8x128xf32>
    %31 = math.exp %30 : vector<8x128xf32>
    %cst_12 = arith.constant 1.000000e+00 : f32
    %32 = vector.broadcast %cst_12 : f32 to vector<8x128xf32>
    %33 = arith.addf %32, %31 : vector<8x128xf32>
    %34 = arith.divf %32, %33 : vector<8x128xf32>
    %35 = math.tanh %29 : vector<8x128xf32>
    %36 = vector.extract_strided_slice %34 {offsets = [0, 0], sizes = [8, 32], strides = [1, 1]} : vector<8x128xf32> to vector<8x32xf32>
    %37 = vector.extract_strided_slice %34 {offsets = [0, 32], sizes = [8, 32], strides = [1, 1]} : vector<8x128xf32> to vector<8x32xf32>
    %38 = vector.extract_strided_slice %35 {offsets = [0, 64], sizes = [8, 32], strides = [1, 1]} : vector<8x128xf32> to vector<8x32xf32>
    %39 = vector.extract_strided_slice %34 {offsets = [0, 96], sizes = [8, 32], strides = [1, 1]} : vector<8x128xf32> to vector<8x32xf32>
    %40 = arith.mulf %37, %24 : vector<8x32xf32>
    %41 = arith.mulf %36, %38 : vector<8x32xf32>
    %42 = arith.addf %40, %41 : vector<8x32xf32>
    %43 = math.tanh %42 : vector<8x32xf32>
    %44 = arith.mulf %39, %43 : vector<8x32xf32>
    %45 = vector.extract_strided_slice %5 {offsets = [16, 0], sizes = [8, 128], strides = [1, 1]} : vector<64x128xf32> to vector<8x128xf32>
    %cst_13 = arith.constant dense<0.000000e+00> : vector<8x128xf32>
    %46 = tpu.matmul %44, %6, %cst_13 {dimension_numbers = #tpu.dot_dimension_numbers<[1], [0], [0], [1], [0, 0, 1, 1], [], []>} : vector<8x32xf32>, vector<32x128xf32>, vector<8x128xf32> -> vector<8x128xf32>
    %47 = arith.addf %45, %46 : vector<8x128xf32>
    %48 = arith.negf %47 : vector<8x128xf32>
    %49 = math.exp %48 : vector<8x128xf32>
    %cst_14 = arith.constant 1.000000e+00 : f32
    %50 = vector.broadcast %cst_14 : f32 to vector<8x128xf32>
    %51 = arith.addf %50, %49 : vector<8x128xf32>
    %52 = arith.divf %50, %51 : vector<8x128xf32>
    %53 = math.tanh %47 : vector<8x128xf32>
    %54 = vector.extract_strided_slice %52 {offsets = [0, 0], sizes = [8, 32], strides = [1, 1]} : vector<8x128xf32> to vector<8x32xf32>
    %55 = vector.extract_strided_slice %52 {offsets = [0, 32], sizes = [8, 32], strides = [1, 1]} : vector<8x128xf32> to vector<8x32xf32>
    %56 = vector.extract_strided_slice %53 {offsets = [0, 64], sizes = [8, 32], strides = [1, 1]} : vector<8x128xf32> to vector<8x32xf32>
    %57 = vector.extract_strided_slice %52 {offsets = [0, 96], sizes = [8, 32], strides = [1, 1]} : vector<8x128xf32> to vector<8x32xf32>
    %58 = arith.mulf %55, %42 : vector<8x32xf32>
    %59 = arith.mulf %54, %56 : vector<8x32xf32>
    %60 = arith.addf %58, %59 : vector<8x32xf32>
    %61 = math.tanh %60 : vector<8x32xf32>
    %62 = arith.mulf %57, %61 : vector<8x32xf32>
    %63 = vector.extract_strided_slice %5 {offsets = [24, 0], sizes = [8, 128], strides = [1, 1]} : vector<64x128xf32> to vector<8x128xf32>
    %cst_15 = arith.constant dense<0.000000e+00> : vector<8x128xf32>
    %64 = tpu.matmul %62, %6, %cst_15 {dimension_numbers = #tpu.dot_dimension_numbers<[1], [0], [0], [1], [0, 0, 1, 1], [], []>} : vector<8x32xf32>, vector<32x128xf32>, vector<8x128xf32> -> vector<8x128xf32>
    %65 = arith.addf %63, %64 : vector<8x128xf32>
    %66 = arith.negf %65 : vector<8x128xf32>
    %67 = math.exp %66 : vector<8x128xf32>
    %cst_16 = arith.constant 1.000000e+00 : f32
    %68 = vector.broadcast %cst_16 : f32 to vector<8x128xf32>
    %69 = arith.addf %68, %67 : vector<8x128xf32>
    %70 = arith.divf %68, %69 : vector<8x128xf32>
    %71 = math.tanh %65 : vector<8x128xf32>
    %72 = vector.extract_strided_slice %70 {offsets = [0, 0], sizes = [8, 32], strides = [1, 1]} : vector<8x128xf32> to vector<8x32xf32>
    %73 = vector.extract_strided_slice %70 {offsets = [0, 32], sizes = [8, 32], strides = [1, 1]} : vector<8x128xf32> to vector<8x32xf32>
    %74 = vector.extract_strided_slice %71 {offsets = [0, 64], sizes = [8, 32], strides = [1, 1]} : vector<8x128xf32> to vector<8x32xf32>
    %75 = vector.extract_strided_slice %70 {offsets = [0, 96], sizes = [8, 32], strides = [1, 1]} : vector<8x128xf32> to vector<8x32xf32>
    %76 = arith.mulf %73, %60 : vector<8x32xf32>
    %77 = arith.mulf %72, %74 : vector<8x32xf32>
    %78 = arith.addf %76, %77 : vector<8x32xf32>
    %79 = math.tanh %78 : vector<8x32xf32>
    %80 = arith.mulf %75, %79 : vector<8x32xf32>
    %81 = vector.extract_strided_slice %5 {offsets = [32, 0], sizes = [8, 128], strides = [1, 1]} : vector<64x128xf32> to vector<8x128xf32>
    %cst_17 = arith.constant dense<0.000000e+00> : vector<8x128xf32>
    %82 = tpu.matmul %80, %6, %cst_17 {dimension_numbers = #tpu.dot_dimension_numbers<[1], [0], [0], [1], [0, 0, 1, 1], [], []>} : vector<8x32xf32>, vector<32x128xf32>, vector<8x128xf32> -> vector<8x128xf32>
    %83 = arith.addf %81, %82 : vector<8x128xf32>
    %84 = arith.negf %83 : vector<8x128xf32>
    %85 = math.exp %84 : vector<8x128xf32>
    %cst_18 = arith.constant 1.000000e+00 : f32
    %86 = vector.broadcast %cst_18 : f32 to vector<8x128xf32>
    %87 = arith.addf %86, %85 : vector<8x128xf32>
    %88 = arith.divf %86, %87 : vector<8x128xf32>
    %89 = math.tanh %83 : vector<8x128xf32>
    %90 = vector.extract_strided_slice %88 {offsets = [0, 0], sizes = [8, 32], strides = [1, 1]} : vector<8x128xf32> to vector<8x32xf32>
    %91 = vector.extract_strided_slice %88 {offsets = [0, 32], sizes = [8, 32], strides = [1, 1]} : vector<8x128xf32> to vector<8x32xf32>
    %92 = vector.extract_strided_slice %89 {offsets = [0, 64], sizes = [8, 32], strides = [1, 1]} : vector<8x128xf32> to vector<8x32xf32>
    %93 = vector.extract_strided_slice %88 {offsets = [0, 96], sizes = [8, 32], strides = [1, 1]} : vector<8x128xf32> to vector<8x32xf32>
    %94 = arith.mulf %91, %78 : vector<8x32xf32>
    %95 = arith.mulf %90, %92 : vector<8x32xf32>
    %96 = arith.addf %94, %95 : vector<8x32xf32>
    %97 = math.tanh %96 : vector<8x32xf32>
    %98 = arith.mulf %93, %97 : vector<8x32xf32>
    %99 = vector.extract_strided_slice %5 {offsets = [40, 0], sizes = [8, 128], strides = [1, 1]} : vector<64x128xf32> to vector<8x128xf32>
    %cst_19 = arith.constant dense<0.000000e+00> : vector<8x128xf32>
    %100 = tpu.matmul %98, %6, %cst_19 {dimension_numbers = #tpu.dot_dimension_numbers<[1], [0], [0], [1], [0, 0, 1, 1], [], []>} : vector<8x32xf32>, vector<32x128xf32>, vector<8x128xf32> -> vector<8x128xf32>
    %101 = arith.addf %99, %100 : vector<8x128xf32>
    %102 = arith.negf %101 : vector<8x128xf32>
    %103 = math.exp %102 : vector<8x128xf32>
    %cst_20 = arith.constant 1.000000e+00 : f32
    %104 = vector.broadcast %cst_20 : f32 to vector<8x128xf32>
    %105 = arith.addf %104, %103 : vector<8x128xf32>
    %106 = arith.divf %104, %105 : vector<8x128xf32>
    %107 = math.tanh %101 : vector<8x128xf32>
    %108 = vector.extract_strided_slice %106 {offsets = [0, 0], sizes = [8, 32], strides = [1, 1]} : vector<8x128xf32> to vector<8x32xf32>
    %109 = vector.extract_strided_slice %106 {offsets = [0, 32], sizes = [8, 32], strides = [1, 1]} : vector<8x128xf32> to vector<8x32xf32>
    %110 = vector.extract_strided_slice %107 {offsets = [0, 64], sizes = [8, 32], strides = [1, 1]} : vector<8x128xf32> to vector<8x32xf32>
    %111 = vector.extract_strided_slice %106 {offsets = [0, 96], sizes = [8, 32], strides = [1, 1]} : vector<8x128xf32> to vector<8x32xf32>
    %112 = arith.mulf %109, %96 : vector<8x32xf32>
    %113 = arith.mulf %108, %110 : vector<8x32xf32>
    %114 = arith.addf %112, %113 : vector<8x32xf32>
    %115 = math.tanh %114 : vector<8x32xf32>
    %116 = arith.mulf %111, %115 : vector<8x32xf32>
    %117 = vector.extract_strided_slice %5 {offsets = [48, 0], sizes = [8, 128], strides = [1, 1]} : vector<64x128xf32> to vector<8x128xf32>
    %cst_21 = arith.constant dense<0.000000e+00> : vector<8x128xf32>
    %118 = tpu.matmul %116, %6, %cst_21 {dimension_numbers = #tpu.dot_dimension_numbers<[1], [0], [0], [1], [0, 0, 1, 1], [], []>} : vector<8x32xf32>, vector<32x128xf32>, vector<8x128xf32> -> vector<8x128xf32>
    %119 = arith.addf %117, %118 : vector<8x128xf32>
    %120 = arith.negf %119 : vector<8x128xf32>
    %121 = math.exp %120 : vector<8x128xf32>
    %cst_22 = arith.constant 1.000000e+00 : f32
    %122 = vector.broadcast %cst_22 : f32 to vector<8x128xf32>
    %123 = arith.addf %122, %121 : vector<8x128xf32>
    %124 = arith.divf %122, %123 : vector<8x128xf32>
    %125 = math.tanh %119 : vector<8x128xf32>
    %126 = vector.extract_strided_slice %124 {offsets = [0, 0], sizes = [8, 32], strides = [1, 1]} : vector<8x128xf32> to vector<8x32xf32>
    %127 = vector.extract_strided_slice %124 {offsets = [0, 32], sizes = [8, 32], strides = [1, 1]} : vector<8x128xf32> to vector<8x32xf32>
    %128 = vector.extract_strided_slice %125 {offsets = [0, 64], sizes = [8, 32], strides = [1, 1]} : vector<8x128xf32> to vector<8x32xf32>
    %129 = vector.extract_strided_slice %124 {offsets = [0, 96], sizes = [8, 32], strides = [1, 1]} : vector<8x128xf32> to vector<8x32xf32>
    %130 = arith.mulf %127, %114 : vector<8x32xf32>
    %131 = arith.mulf %126, %128 : vector<8x32xf32>
    %132 = arith.addf %130, %131 : vector<8x32xf32>
    %133 = math.tanh %132 : vector<8x32xf32>
    %134 = arith.mulf %129, %133 : vector<8x32xf32>
    %135 = vector.extract_strided_slice %5 {offsets = [56, 0], sizes = [8, 128], strides = [1, 1]} : vector<64x128xf32> to vector<8x128xf32>
    %cst_23 = arith.constant dense<0.000000e+00> : vector<8x128xf32>
    %136 = tpu.matmul %134, %6, %cst_23 {dimension_numbers = #tpu.dot_dimension_numbers<[1], [0], [0], [1], [0, 0, 1, 1], [], []>} : vector<8x32xf32>, vector<32x128xf32>, vector<8x128xf32> -> vector<8x128xf32>
    %137 = arith.addf %135, %136 : vector<8x128xf32>
    %138 = arith.negf %137 : vector<8x128xf32>
    %139 = math.exp %138 : vector<8x128xf32>
    %cst_24 = arith.constant 1.000000e+00 : f32
    %140 = vector.broadcast %cst_24 : f32 to vector<8x128xf32>
    %141 = arith.addf %140, %139 : vector<8x128xf32>
    %142 = arith.divf %140, %141 : vector<8x128xf32>
    %143 = math.tanh %137 : vector<8x128xf32>
    %144 = vector.extract_strided_slice %142 {offsets = [0, 0], sizes = [8, 32], strides = [1, 1]} : vector<8x128xf32> to vector<8x32xf32>
    %145 = vector.extract_strided_slice %142 {offsets = [0, 32], sizes = [8, 32], strides = [1, 1]} : vector<8x128xf32> to vector<8x32xf32>
    %146 = vector.extract_strided_slice %143 {offsets = [0, 64], sizes = [8, 32], strides = [1, 1]} : vector<8x128xf32> to vector<8x32xf32>
    %147 = vector.extract_strided_slice %142 {offsets = [0, 96], sizes = [8, 32], strides = [1, 1]} : vector<8x128xf32> to vector<8x32xf32>
    %148 = arith.mulf %145, %132 : vector<8x32xf32>
    %149 = arith.mulf %144, %146 : vector<8x32xf32>
    %150 = arith.addf %148, %149 : vector<8x32xf32>
    %151 = math.tanh %150 : vector<8x32xf32>
    %152 = arith.mulf %147, %151 : vector<8x32xf32>
    %153 = tpu.concatenate %26, %44, %62, %80, %98, %116, %134, %152 in 0 : vector<8x32xf32>, vector<8x32xf32>, vector<8x32xf32>, vector<8x32xf32>, vector<8x32xf32>, vector<8x32xf32>, vector<8x32xf32>, vector<8x32xf32> -> vector<64x32xf32>
    %cst_25 = arith.constant 5.000000e-01 : f32
    %154 = vector.broadcast %cst_25 : f32 to vector<64x32xf32>
    %155 = arith.mulf %154, %153 : vector<64x32xf32>
    %cst_26 = arith.constant 0.707106769 : f32
    %156 = vector.broadcast %cst_26 : f32 to vector<64x32xf32>
    %157 = arith.mulf %153, %156 : vector<64x32xf32>
    %158 = math.erf %157 : vector<64x32xf32>
    %cst_27 = arith.constant 1.000000e+00 : f32
    %159 = vector.broadcast %cst_27 : f32 to vector<64x32xf32>
    %160 = arith.addf %159, %158 : vector<64x32xf32>
    %161 = arith.mulf %155, %160 : vector<64x32xf32>
    %c0_28 = arith.constant 0 : index
    %c0_29 = arith.constant 0 : index
    %162 = vector.load %arg4[%c0_28, %c0_29] : memref<32x32xf32, #tpu.memory_space<vmem>>, vector<32x32xf32>
    %cst_30 = arith.constant dense<0.000000e+00> : vector<64x32xf32>
    %163 = tpu.matmul %161, %162, %cst_30 {dimension_numbers = #tpu.dot_dimension_numbers<[1], [0], [0], [1], [0, 0, 1, 1], [], []>} : vector<64x32xf32>, vector<32x32xf32>, vector<64x32xf32> -> vector<64x32xf32>
    %c0_31 = arith.constant 0 : index
    %c0_32 = arith.constant 0 : index
    %164 = vector.load %arg5[%c0_31, %c0_32] : memref<1x32xf32, #tpu.memory_space<vmem>>, vector<1x32xf32>
    %165 = vector.broadcast %164 : vector<1x32xf32> to vector<64x32xf32>
    %166 = arith.addf %163, %165 : vector<64x32xf32>
    %cst_33 = arith.constant 5.000000e-01 : f32
    %167 = vector.broadcast %cst_33 : f32 to vector<64x32xf32>
    %168 = arith.mulf %167, %166 : vector<64x32xf32>
    %cst_34 = arith.constant 0.707106769 : f32
    %169 = vector.broadcast %cst_34 : f32 to vector<64x32xf32>
    %170 = arith.mulf %166, %169 : vector<64x32xf32>
    %171 = math.erf %170 : vector<64x32xf32>
    %cst_35 = arith.constant 1.000000e+00 : f32
    %172 = vector.broadcast %cst_35 : f32 to vector<64x32xf32>
    %173 = arith.addf %172, %171 : vector<64x32xf32>
    %174 = arith.mulf %168, %173 : vector<64x32xf32>
    %175 = arith.mulf %174, %174 : vector<64x32xf32>
    %cst_36 = arith.constant dense<0.000000e+00> : vector<64xf32>
    %176 = vector.multi_reduction <add>, %175, %cst_36 [1] : vector<64x32xf32> to vector<64xf32>
    %177 = vector.shape_cast %176 : vector<64xf32> to vector<64x1xf32>
    %cst_37 = arith.constant 1.000000e-24 : f32
    %178 = vector.broadcast %cst_37 : f32 to vector<64x1xf32>
    %179 = arith.maximumf %177, %178 : vector<64x1xf32>
    %180 = math.rsqrt %179 : vector<64x1xf32>
    %181 = vector.broadcast %180 : vector<64x1xf32> to vector<64x32xf32>
    %182 = arith.mulf %174, %181 : vector<64x32xf32>
    %c0_38 = arith.constant 0 : index
    %c0_39 = arith.constant 0 : index
    %183 = vector.load %arg6[%c0_38, %c0_39] : memref<64x32xf32, #tpu.memory_space<vmem>>, vector<64x32xf32>
    tpu.vector_store %arg6[%c0_38, %c0_39], %182 {strides = array<i32>} : memref<64x32xf32, #tpu.memory_space<vmem>>, vector<64x32xf32>,
    return
  }
}

</mosaic_0001>

<bundles_post_ra>
// kernel: tpu_custom_call.1
= control target key start
LH: loop header
LB: loop body
LE: loop exit
PB: predicated region body
PF: predicated region fallthrough
CT: control target
= control target key end

     0   :  { %vm42_vm0 = vcmask 261120   ;;  %v1627_v8 = vmov 0.0   ;;  %vm1628_vm1 = vmmov 0   ;;  %s1629_s25 = smov 64   ;;  %s2024_s1 = inlined_call_operand.vmem [shape: f32[32,128], index: 1, kind: input, shape index: {}]   ;;  %s2025_s0 = inlined_call_operand.vmem [shape: f32[64,32], index: 0, kind: input, shape index: {}]   ;;  %s2026_s2 = inlined_call_operand.vmem [shape: f32[32,128], index: 2, kind: input, shape index: {}]   ;;  %s2027_s3 = inlined_call_operand.vmem [shape: f32[1,128], index: 3, kind: input, shape index: {}]   ;;  %s2028_s4 = inlined_call_operand.vmem [shape: f32[32,32], index: 4, kind: input, shape index: {}]   ;;  %s2029_s5 = inlined_call_operand.vmem [shape: f32[1,32], index: 5, kind: input, shape index: {}]   ;;  %s2030_s6 = inlined_call_operand.vmem [shape: f32[64,32], index: 6, kind: output, shape index: {}]  }
   0x1   :  { %v34_v0 = vld [vmem:[%s2024_s1 + $0x18] sm:$0xff]  ;;  %v33_v1 = vld [vmem:[%s2024_s1 + $0x10] sm:$0xff]  ;;  %v32_v2 = vld [vmem:[%s2024_s1 + $0x8] sm:$0xff] }
   0x2   :  { %1503 = vmatprep.subr.mxu1 %v34_v0  ;;  %1375 = vmatprep.subr.mxu0 %v34_v0  ;;  %v27_v3 = vld [vmem:[%s2025_s0 + $0x20] sm:$0xff]  ;;  %v28_v5 = vld [vmem:[%s2025_s0 + $0x28] sm:$0xff]  ;;  %v1688_v6 = vld [vmem:[%s2026_s2 + $0x18] sm:$0xff] }
   0x3   :  { %1507 = vmatpush3.msra.mxu1 %v34_v0  ;;  %1376 = vmatpush3.msra.mxu0 %v34_v0  ;;  %v31_v4 = vld [vmem:[%s2024_s1] sm:$0xff]  ;;  %v24_v9 = vld [vmem:[%s2025_s0 + $0x8] sm:$0xff]  ;;  %v29_v10 = vld [vmem:[%s2025_s0 + $0x30] sm:$0xff] }
   0x4   :  { %1504 = vmatprep.subr.mxu1 %v33_v1  ;;  %1377 = vmatprep.subr.mxu0 %v33_v1  ;;  %v23_v7 = vld [vmem:[%s2025_s0] sm:$0xff]  ;;  %v1705_v11 = vld [vmem:[%s2026_s2 + $0x10] sm:$0xff]  ;;  %v30_v12 = vld [vmem:[%s2025_s0 + $0x38] sm:$0xff] }
   0x5   :  { %1508 = vmatpush3.msra.mxu1 %v33_v1  ;;  %1378 = vmatpush3.msra.mxu0 %v33_v1  ;;  %v1717_v13 = vld [vmem:[%s2026_s2 + $0x8] sm:$0xff]  ;;  %v1726_v14 = vld [vmem:[%s2026_s2] sm:$0xff]  ;;  %v25_v54 = vld [vmem:[%s2025_s0 + $0x10] sm:$0xff] }
   0x6   :  { %1505 = vmatprep.subr.mxu1 %v32_v2  ;;  %1379 = vmatprep.subr.mxu0 %v32_v2  ;;  %v1762_v20 = vld [vmem:[%s2027_s3] ss:$0 sm:$0xff]  ;;  %s1630_s3 = smov 32   ;;  %v26_v55 = vld [vmem:[%s2025_s0 + $0x18] sm:$0xff] }
   0x7   :  { %1509 = vmatpush3.msra.mxu1 %v32_v2  ;;  %1389 = vmatprep.mubr.msk.f32.mxu1 %vm42_vm0, %v27_v3 }
   0x8   :  { %1506 = vmatprep.subr.mxu1 %v31_v4  ;;  %1380 = vmatpush3.msra.mxu0 %v32_v2 }
   0x9   :  { %1510 = vmatpush3.msra.mxu1 %v31_v4  ;;  %1381 = vmatprep.subr.mxu0 %v31_v4 }
   0xa   :  { %1390 = vmatmul.mubr.msk.f32.vlgmr.msra.gmra.mxu1 %vm42_vm0, %v28_v5  ;;  %1395 = vmatprep.subr.mxu1 %v1627_v8 }
   0xb   :  { %1396 = vmatpush3.msra.mxu1 %v1688_v6  ;;  %1382 = vmatpush3.msra.mxu0 %v31_v4 }
   0xc   :  { %1383 = vmatprep.mubr.msk.f32.mxu0 %vm42_vm0, %v23_v7  ;;  %1397 = vmatprep.subr.mxu1 %v1627_v8 }
   0xd   :  { %1384 = vmatmul.mubr.msk.f32.vlgmr.msra.gmra.mxu0 %vm42_vm0, %v24_v9  ;;  %1392 = vmatprep.mubr.msk.f32.mxu1 %vm42_vm0, %v29_v10 }
   0xe   :  { %1398 = vmatpush3.msra.mxu1 %v1705_v11  ;;  %1417 = vmatprep.subr.mxu0 %v1627_v8 }
   0xf   :  { %1393 = vmatmul.mubr.msk.f32.gmra.mxu1 %vm42_vm0, %v30_v12  ;;  %1399 = vmatprep.subr.mxu1 %v1627_v8 }
  0x10   :  { %1400 = vmatpush3.msra.mxu1 %v1717_v13  ;;  %1403 = vmatprep.mubr.msk.f32.mxu1 %vm1628_vm1, %v1627_v8 }
  0x11   :  { %1401 = vmatprep.subr.mxu1 %v1627_v8  ;;  %1418 = vmatpush3.msra.mxu0 %v1688_v6 }
  0x12   :  { %1402 = vmatpush3.msra.mxu1 %v1726_v14  ;;  %1419 = vmatprep.subr.mxu0 %v1627_v8 }
  0x13   :  { %1404 = vmatmul.mubr.f32.vlgmr.msra.gmra.mxu1 %v1627_v8  ;;  %1406 = vmatprep.subr.mxu1 %v1627_v8 }
  0x14   :  { %1407 = vmatpush3.msra.mxu1 %v1688_v6  ;;  %1414 = vmatprep.mubr.msk.f32.mxu1 %vm1628_vm1, %v1627_v8 }
  0x15   :  { %1408 = vmatprep.subr.mxu1 %v1627_v8  ;;  %1420 = vmatpush3.msra.mxu0 %v1705_v11 }
  0x16   :  { %1409 = vmatpush3.msra.mxu1 %v1705_v11  ;;  %1421 = vmatprep.subr.mxu0 %v1627_v8 }
  0x17   :  { %1410 = vmatprep.subr.mxu1 %v1627_v8  ;;  %1422 = vmatpush3.msra.mxu0 %v1717_v13 }
  0x18   :  { %1411 = vmatpush3.msra.mxu1 %v1717_v13  ;;  %1423 = vmatprep.subr.mxu0 %v1627_v8 }
  0x19   :  { %1412 = vmatprep.subr.mxu1 %v1627_v8  ;;  %1424 = vmatpush3.msra.mxu0 %v1726_v14 }
  0x1a   :  { %1413 = vmatpush3.msra.mxu1 %v1726_v14  ;;  %1439 = vmatprep.subr.mxu0 %v1627_v8 }
  0x1b   :  { %1428 = vmatprep.subr.mxu1 %v1627_v8  ;;  %1386 = vmatprep.mubr.msk.f32.mxu0 %vm42_vm0, %v25_v54 }
  0x1c   :  { %1387 = vmatmul.mubr.msk.f32.gmra.mxu0 %vm42_vm0, %v26_v55 }
  0x1d   :  { %1425 = vmatprep.mubr.msk.f32.mxu0 %vm1628_vm1, %v1627_v8 }
  0xca   :  { %v1753_v15 = vpop.f32.mrf.mxu1 }
  0xcc   :  { %v1755_v16 = vpop.f32.mrf.mxu1 }
  0xcd   :  { %v1385_v17 = vpop.f32.mrf.mxu0 }
  0xce   :  { %v139_v40 = vadd.f32 %v1385_v17, %v1762_v20 }
  0xcf   :  { %v1757_v18 = vpop.f32.mrf.mxu1  ;;  %v133_v19 = vpop.f32.mrf.mxu0 }
  0xd0   :  { %v134_v22 = vadd.f32 %v1762_v20, %v133_v19 }
  0xd1   :  { %v1764_v21 = vpop.f32.mrf.mxu1 }
  0xd3   :  { %v245_v23 = vpop.f32.mrf.mxu1 }
  0xd4   :  { %v249_v24 = vadd.f32 %v245_v23, %v134_v22 }
  0xd5   :  { %v1405_v25 = vpop.f32.mrf.mxu1 }
  0xd6   :  { %1515 = vtanh.f32 %v249_v24  ;;  %v1287_v27 = vmul.f32 -1.442695, %v249_v24 }
  0xd8   :  { %1517 = vpow2.f32 %v1287_v27 }
  0xdc   :  { %v1388_v60 = vpop.f32.mrf.mxu0 }
  0xde   :  { %v143_v61 = vpop.f32.mrf.mxu0 }
  0xdf   :  { %v144_v62 = vadd.f32 %v1762_v20, %v143_v61 }
  0xe3   :  { %v1516_v26 = vpop.eup %1515 }
  0xe4   :  { %259 = vrot.lane.b32.xlu0 %v1516_v26, %s1629_s25  ;;  %v149_v26 = vadd.f32 %v1388_v60, %v1762_v20 }
  0xe5   :  { %v1518_v28 = vpop.eup %1517 }
  0xe6   :  { %v253_v29 = vadd.f32 1.0, %v1518_v28 }
  0xe8   :  { %1519 = vrcp.f32 %v253_v29 }
  0xf5   :  { %v1520_v30 = vpop.eup %1519 }
  0xf6   :  { %v257_v33 = vmul.f32 0.0, %v1520_v30 }
 0x156   :  { %v260_v31 = vpop.permute.xlu0 %259 }
 0x157   :  { %v262_v32 = vmul.f32 %v1520_v30, %v260_v31 }
 0x159   :  { %264 = vrot.lane.b32.xlu0 %v262_v32, %s1630_s3 }
 0x1cb   :  { %v265_v34 = vpop.permute.xlu0 %264 }
 0x1cc   :  { %v267_v35 = vadd.f32 %v265_v34, %v257_v33 }
 0x1ce   :  { %1521 = vtanh.f32 %v267_v35 }
 0x1db   :  { %v1522_v36 = vpop.eup %1521 }
 0x1dc   :  { %270 = vrot.lane.b32.xlu1 %v1522_v36, %s1629_s25 }
 0x24e   :  { %v271_v37 = vpop.permute.xlu1 %270 }
 0x24f   :  { %v1770_v38 = vmul.f32 %v1520_v30, %v271_v37 }
 0x251   :  { %275 = vrot.lane.b32.xlu1 %v1770_v38, %s1630_s3 }
 0x2c3   :  { %v276_v39 = vpop.permute.xlu1 %275 }
 0x2c4   :  { %1415 = vmatmul.mubr.msk.f32.vlgmr.msra.gmra.mxu1 %vm42_vm0, %v276_v39 }
 0x2c5   :  { %1429 = vmatpush3.msra.mxu1 %v1688_v6  ;;  %1436 = vmatprep.mubr.msk.f32.mxu1 %vm1628_vm1, %v1627_v8 }
 0x2c6   :  { %1430 = vmatprep.subr.mxu1 %v1627_v8 }
 0x2c7   :  { %1431 = vmatpush3.msra.mxu1 %v1705_v11 }
 0x2c8   :  { %1432 = vmatprep.subr.mxu1 %v1627_v8 }
 0x2c9   :  { %1433 = vmatpush3.msra.mxu1 %v1717_v13 }
 0x2ca   :  { %1434 = vmatprep.subr.mxu1 %v1627_v8 }
 0x2cb   :  { %1435 = vmatpush3.msra.mxu1 %v1726_v14 }
 0x2cc   :  { %1450 = vmatprep.subr.mxu1 %v1627_v8 }
 0x384   :  { %v345_v41 = vpop.f32.mrf.mxu1 }
 0x385   :  { %v349_v42 = vadd.f32 %v345_v41, %v139_v40 }
 0x386   :  { %v1416_v43 = vpop.f32.mrf.mxu1 }
 0x387   :  { %1523 = vtanh.f32 %v349_v42  ;;  %v1289_v45 = vmul.f32 -1.442695, %v349_v42 }
 0x389   :  { %1525 = vpow2.f32 %v1289_v45  ;;  %v154_v45 = vadd.f32 %v1762_v20, %v1755_v16 }
 0x394   :  { %v1524_v44 = vpop.eup %1523 }
 0x395   :  { %359 = vrot.lane.b32.xlu0 %v1524_v44, %s1629_s25 }
 0x396   :  { %v1526_v46 = vpop.eup %1525 }
 0x397   :  { %v353_v47 = vadd.f32 1.0, %v1526_v46 }
 0x399   :  { %1527 = vrcp.f32 %v353_v47 }
 0x3a6   :  { %v1528_v48 = vpop.eup %1527 }
 0x3a7   :  { %v357_v51 = vmul.f32 %v1528_v48, %v267_v35 }
 0x407   :  { %v360_v49 = vpop.permute.xlu0 %359 }
 0x408   :  { %v362_v50 = vmul.f32 %v1528_v48, %v360_v49 }
 0x40a   :  { %364 = vrot.lane.b32.xlu1 %v362_v50, %s1630_s3 }
 0x47c   :  { %v365_v52 = vpop.permute.xlu1 %364 }
 0x47d   :  { %v367_v53 = vadd.f32 %v365_v52, %v357_v51 }
 0x47f   :  { %1529 = vtanh.f32 %v367_v53 }
 0x48c   :  { %v1530_v56 = vpop.eup %1529 }
 0x48d   :  { %370 = vrot.lane.b32.xlu0 %v1530_v56, %s1629_s25 }
 0x4ff   :  { %v371_v57 = vpop.permute.xlu0 %370 }
 0x500   :  { %v1799_v58 = vmul.f32 %v1528_v48, %v371_v57 }
 0x502   :  { %375 = vrot.lane.b32.xlu1 %v1799_v58, %s1630_s3 }
 0x574   :  { %v376_v59 = vpop.permute.xlu1 %375 }
 0x575   :  { %1426 = vmatmul.mubr.msk.f32.vlgmr.msra.gmra.mxu0 %vm42_vm0, %v376_v59 }
 0x576   :  { %1440 = vmatpush3.msra.mxu0 %v1688_v6  ;;  %1447 = vmatprep.mubr.msk.f32.mxu0 %vm1628_vm1, %v1627_v8 }
 0x577   :  { %1441 = vmatprep.subr.mxu0 %v1627_v8 }
 0x578   :  { %1442 = vmatpush3.msra.mxu0 %v1705_v11 }
 0x579   :  { %1443 = vmatprep.subr.mxu0 %v1627_v8 }
 0x57a   :  { %1444 = vmatpush3.msra.mxu0 %v1717_v13 }
 0x57b   :  { %1445 = vmatprep.subr.mxu0 %v1627_v8 }
 0x57c   :  { %1446 = vmatpush3.msra.mxu0 %v1726_v14 }
 0x57d   :  { %1461 = vmatprep.subr.mxu0 %v1627_v8 }
 0x635   :  { %v445_v63 = vpop.f32.mrf.mxu0 }
 0x636   :  { %v449_v0 = vadd.f32 %v445_v63, %v144_v62  ;;  %v159_v63 = vadd.f32 %v1753_v15, %v1762_v20 }
 0x637   :  { %v1427_v1 = vpop.f32.mrf.mxu0 }
 0x638   :  { %1531 = vtanh.f32 %v449_v0  ;;  %v1291_v3 = vmul.f32 -1.442695, %v449_v0 }
 0x63a   :  { %1533 = vpow2.f32 %v1291_v3 }
 0x645   :  { %v1532_v2 = vpop.eup %1531 }
 0x646   :  { %459 = vrot.lane.b32.xlu0 %v1532_v2, %s1629_s25 }
 0x647   :  { %v1534_v4 = vpop.eup %1533 }
 0x648   :  { %v453_v5 = vadd.f32 1.0, %v1534_v4 }
 0x64a   :  { %1535 = vrcp.f32 %v453_v5 }
 0x657   :  { %v1536_v7 = vpop.eup %1535 }
 0x658   :  { %v457_v12 = vmul.f32 %v1536_v7, %v367_v53 }
 0x6b8   :  { %v460_v9 = vpop.permute.xlu0 %459 }
 0x6b9   :  { %v462_v10 = vmul.f32 %v1536_v7, %v460_v9 }
 0x6bb   :  { %464 = vrot.lane.b32.xlu1 %v462_v10, %s1630_s3 }
 0x72d   :  { %v465_v17 = vpop.permute.xlu1 %464 }
 0x72e   :  { %v467_v19 = vadd.f32 %v465_v17, %v457_v12 }
 0x730   :  { %1537 = vtanh.f32 %v467_v19 }
 0x73d   :  { %v1538_v22 = vpop.eup %1537 }
 0x73e   :  { %470 = vrot.lane.b32.xlu0 %v1538_v22, %s1629_s25 }
 0x7b0   :  { %v471_v23 = vpop.permute.xlu0 %470 }
 0x7b1   :  { %v1818_v24 = vmul.f32 %v1536_v7, %v471_v23 }
 0x7b3   :  { %475 = vrot.lane.b32.xlu1 %v1818_v24, %s1630_s3 }
 0x825   :  { %v476_v25 = vpop.permute.xlu1 %475 }
 0x826   :  { %1437 = vmatmul.mubr.msk.f32.vlgmr.msra.gmra.mxu1 %vm42_vm0, %v476_v25 }
 0x827   :  { %1451 = vmatpush3.msra.mxu1 %v1688_v6  ;;  %1458 = vmatprep.mubr.msk.f32.mxu1 %vm1628_vm1, %v1627_v8 }
 0x828   :  { %1452 = vmatprep.subr.mxu1 %v1627_v8 }
 0x829   :  { %1453 = vmatpush3.msra.mxu1 %v1705_v11 }
 0x82a   :  { %1454 = vmatprep.subr.mxu1 %v1627_v8 }
 0x82b   :  { %1455 = vmatpush3.msra.mxu1 %v1717_v13 }
 0x82c   :  { %1456 = vmatprep.subr.mxu1 %v1627_v8 }
 0x82d   :  { %1457 = vmatpush3.msra.mxu1 %v1726_v14 }
 0x82e   :  { %1472 = vmatprep.subr.mxu1 %v1627_v8 }
 0x8e6   :  { %v545_v27 = vpop.f32.mrf.mxu1 }
 0x8e7   :  { %v549_v28 = vadd.f32 %v545_v27, %v149_v26 }
 0x8e8   :  { %v1438_v29 = vpop.f32.mrf.mxu1 }
 0x8e9   :  { %1539 = vtanh.f32 %v549_v28  ;;  %v1293_v31 = vmul.f32 -1.442695, %v549_v28 }
 0x8eb   :  { %1541 = vpow2.f32 %v1293_v31 }
 0x8f6   :  { %v1540_v30 = vpop.eup %1539 }
 0x8f7   :  { %559 = vrot.lane.b32.xlu0 %v1540_v30, %s1629_s25 }
 0x8f8   :  { %v1542_v32 = vpop.eup %1541 }
 0x8f9   :  { %v553_v33 = vadd.f32 1.0, %v1542_v32 }
 0x8fb   :  { %1543 = vrcp.f32 %v553_v33 }
 0x908   :  { %v1544_v34 = vpop.eup %1543 }
 0x909   :  { %v557_v37 = vmul.f32 %v1544_v34, %v467_v19  ;;  %v164_v19 = vadd.f32 %v1762_v20, %v1764_v21 }
 0x969   :  { %v560_v35 = vpop.permute.xlu0 %559 }
 0x96a   :  { %v562_v36 = vmul.f32 %v1544_v34, %v560_v35 }
 0x96c   :  { %564 = vrot.lane.b32.xlu1 %v562_v36, %s1630_s3 }
 0x9de   :  { %v565_v39 = vpop.permute.xlu1 %564 }
 0x9df   :  { %v567_v40 = vadd.f32 %v565_v39, %v557_v37 }
 0x9e1   :  { %1545 = vtanh.f32 %v567_v40 }
 0x9ee   :  { %v1546_v41 = vpop.eup %1545 }
 0x9ef   :  { %570 = vrot.lane.b32.xlu0 %v1546_v41, %s1629_s25 }
 0xa61   :  { %v571_v42 = vpop.permute.xlu0 %570 }
 0xa62   :  { %v1837_v43 = vmul.f32 %v1544_v34, %v571_v42 }
 0xa64   :  { %575 = vrot.lane.b32.xlu1 %v1837_v43, %s1630_s3 }
 0xad6   :  { %v576_v44 = vpop.permute.xlu1 %575 }
 0xad7   :  { %1448 = vmatmul.mubr.msk.f32.vlgmr.msra.gmra.mxu0 %vm42_vm0, %v576_v44 }
 0xad8   :  { %1462 = vmatpush3.msra.mxu0 %v1688_v6  ;;  %1469 = vmatprep.mubr.msk.f32.mxu0 %vm1628_vm1, %v1627_v8 }
 0xad9   :  { %1463 = vmatprep.subr.mxu0 %v1627_v8 }
 0xada   :  { %1464 = vmatpush3.msra.mxu0 %v1705_v11 }
 0xadb   :  { %1465 = vmatprep.subr.mxu0 %v1627_v8 }
 0xadc   :  { %1466 = vmatpush3.msra.mxu0 %v1717_v13 }
 0xadd   :  { %1467 = vmatprep.subr.mxu0 %v1627_v8 }
 0xade   :  { %1468 = vmatpush3.msra.mxu0 %v1726_v14 }
 0xb97   :  { %v645_v46 = vpop.f32.mrf.mxu0 }
 0xb98   :  { %v649_v47 = vadd.f32 %v645_v46, %v154_v45 }
 0xb99   :  { %v1449_v48 = vpop.f32.mrf.mxu0 }
 0xb9a   :  { %1547 = vtanh.f32 %v649_v47  ;;  %v1295_v50 = vmul.f32 -1.442695, %v649_v47  ;;  %v982_v48 = vmul.f32 0.70710677, %v1770_v38 }
 0xb9c   :  { %1549 = vpow2.f32 %v1295_v50  ;;  %v984_v50 = vmul.f32 0.70710677, %v1818_v24 }
 0xba7   :  { %v1548_v49 = vpop.eup %1547 }
 0xba8   :  { %659 = vrot.lane.b32.xlu0 %v1548_v49, %s1629_s25 }
 0xba9   :  { %v1550_v51 = vpop.eup %1549 }
 0xbaa   :  { %v653_v52 = vadd.f32 1.0, %v1550_v51 }
 0xbac   :  { %1551 = vrcp.f32 %v653_v52 }
 0xbb9   :  { %v1552_v53 = vpop.eup %1551 }
 0xbba   :  { %v657_v56 = vmul.f32 %v1552_v53, %v567_v40  ;;  %v169_v40 = vadd.f32 %v1757_v18, %v1762_v20 }
 0xc1a   :  { %v660_v54 = vpop.permute.xlu0 %659 }
 0xc1b   :  { %v662_v55 = vmul.f32 %v1552_v53, %v660_v54 }
 0xc1d   :  { %664 = vrot.lane.b32.xlu1 %v662_v55, %s1630_s3 }
 0xc8f   :  { %v665_v57 = vpop.permute.xlu1 %664 }
 0xc90   :  { %v667_v16 = vadd.f32 %v665_v57, %v657_v56  ;;  %v974_v57 = vmul.f32 0.5, %v1770_v38 }
 0xc92   :  { %1553 = vtanh.f32 %v667_v16 }
 0xc9f   :  { %v1554_v59 = vpop.eup %1553 }
 0xca0   :  { %670 = vrot.lane.b32.xlu0 %v1554_v59, %s1629_s25 }
 0xd12   :  { %v671_v60 = vpop.permute.xlu0 %670 }
 0xd13   :  { %v1856_v61 = vmul.f32 %v1552_v53, %v671_v60 }
 0xd15   :  { %675 = vrot.lane.b32.xlu1 %v1856_v61, %s1630_s3  ;;  %v986_v18 = vmul.f32 0.70710677, %v1856_v61 }
 0xd87   :  { %v676_v62 = vpop.permute.xlu1 %675 }
 0xd88   :  { %1459 = vmatmul.mubr.msk.f32.vlgmr.msra.gmra.mxu1 %vm42_vm0, %v676_v62  ;;  %v976_v62 = vmul.f32 0.5, %v1818_v24  ;;  %v1017_v24 = vld [vmem:[%s2028_s4 + $0x18] sm:$0xff] }
 0xd89   :  { %1473 = vmatpush3.msra.mxu1 %v1688_v6  ;;  %1480 = vmatprep.mubr.msk.f32.mxu1 %vm1628_vm1, %v1627_v8 }
 0xd8a   :  { %1474 = vmatprep.subr.mxu1 %v1627_v8  ;;  %1483 = vmatprep.subr.mxu0 %v1017_v24 }
 0xd8b   :  { %1475 = vmatpush3.msra.mxu1 %v1705_v11 }
 0xd8c   :  { %1476 = vmatprep.subr.mxu1 %v1627_v8 }
 0xd8d   :  { %1477 = vmatpush3.msra.mxu1 %v1717_v13 }
 0xd8e   :  { %1478 = vmatprep.subr.mxu1 %v1627_v8 }
 0xd8f   :  { %1479 = vmatpush3.msra.mxu1 %v1726_v14 }
 0xe48   :  { %v745_v0 = vpop.f32.mrf.mxu1 }
 0xe49   :  { %v749_v6 = vadd.f32 %v745_v0, %v159_v63 }
 0xe4a   :  { %v1460_v1 = vpop.f32.mrf.mxu1 }
 0xe4b   :  { %1555 = vtanh.f32 %v749_v6  ;;  %v1297_v3 = vmul.f32 -1.442695, %v749_v6  ;;  %v978_v1 = vmul.f32 0.5, %v1856_v61  ;;  %v983_v61 = vmul.f32 0.70710677, %v1799_v58 }
 0xe4d   :  { %1557 = vpow2.f32 %v1297_v3 }
 0xe58   :  { %v1556_v2 = vpop.eup %1555 }
 0xe59   :  { %759 = vrot.lane.b32.xlu0 %v1556_v2, %s1629_s25 }
 0xe5a   :  { %v1558_v11 = vpop.eup %1557 }
 0xe5b   :  { %v753_v4 = vadd.f32 1.0, %v1558_v11 }
 0xe5d   :  { %1559 = vrcp.f32 %v753_v4  ;;  %v1016_v4 = vld [vmem:[%s2028_s4 + $0x10] sm:$0xff] }
 0xe6a   :  { %v1560_v13 = vpop.eup %1559 }
 0xe6b   :  { %v757_v14 = vmul.f32 %v1560_v13, %v667_v16 }
 0xecb   :  { %v760_v5 = vpop.permute.xlu0 %759 }
 0xecc   :  { %v762_v8 = vmul.f32 %v1560_v13, %v760_v5 }
 0xece   :  { %764 = vrot.lane.b32.xlu1 %v762_v8, %s1630_s3 }
 0xf40   :  { %v765_v7 = vpop.permute.xlu1 %764 }
 0xf41   :  { %v767_v15 = vadd.f32 %v765_v7, %v757_v14 }
 0xf43   :  { %1561 = vtanh.f32 %v767_v15 }
 0xf50   :  { %v1562_v9 = vpop.eup %1561 }
 0xf51   :  { %770 = vrot.lane.b32.xlu0 %v1562_v9, %s1629_s25 }
 0xfc3   :  { %v771_v10 = vpop.permute.xlu0 %770 }
 0xfc4   :  { %v1875_v12 = vmul.f32 %v1560_v13, %v771_v10  ;;  %v985_v13 = vmul.f32 0.70710677, %v1837_v43  ;;  %v1014_v10 = vld [vmem:[%s2028_s4] sm:$0xff] }
 0xfc6   :  { %775 = vrot.lane.b32.xlu1 %v1875_v12, %s1630_s3  ;;  %v987_v7 = vmul.f32 0.70710677, %v1875_v12 }
0x1038   :  { %v776_v17 = vpop.permute.xlu1 %775 }
0x1039   :  { %1470 = vmatmul.mubr.msk.f32.vlgmr.msra.gmra.mxu0 %vm42_vm0, %v776_v17 }
0x103a   :  { %1484 = vmatpush3.msra.mxu0 %v1017_v24 }
0x103b   :  { %1485 = vmatprep.subr.mxu0 %v1016_v4 }
0x103c   :  { %1486 = vmatpush3.msra.mxu0 %v1016_v4 }
0x10f9   :  { %v845_v22 = vpop.f32.mrf.mxu0 }
0x10fa   :  { %v849_v23 = vadd.f32 %v845_v22, %v164_v19 }
0x10fb   :  { %v1471_v25 = vpop.f32.mrf.mxu0 }
0x10fc   :  { %1563 = vtanh.f32 %v849_v23  ;;  %v1299_v27 = vmul.f32 -1.442695, %v849_v23  ;;  %v975_v25 = vmul.f32 0.5, %v1799_v58 }
0x10fe   :  { %1565 = vpow2.f32 %v1299_v27 }
0x1109   :  { %v1564_v26 = vpop.eup %1563 }
0x110a   :  { %859 = vrot.lane.b32.xlu0 %v1564_v26, %s1629_s25 }
0x110b   :  { %v1566_v28 = vpop.eup %1565 }
0x110c   :  { %v853_v29 = vadd.f32 1.0, %v1566_v28 }
0x110e   :  { %1567 = vrcp.f32 %v853_v29  ;;  %v977_v29 = vmul.f32 0.5, %v1837_v43 }
0x111b   :  { %v1568_v30 = vpop.eup %1567 }
0x111c   :  { %v857_v33 = vmul.f32 %v1568_v30, %v767_v15  ;;  %v1015_v15 = vld [vmem:[%s2028_s4 + $0x8] sm:$0xff] }
0x111d   :  { %1487 = vmatprep.subr.mxu0 %v1015_v15 }
0x111e   :  { %1488 = vmatpush3.msra.mxu0 %v1015_v15 }
0x111f   :  { %1489 = vmatprep.subr.mxu0 %v1014_v10 }
0x1120   :  { %1490 = vmatpush3.msra.mxu0 %v1014_v10 }
0x117c   :  { %v860_v31 = vpop.permute.xlu0 %859 }
0x117d   :  { %v862_v32 = vmul.f32 %v1568_v30, %v860_v31 }
0x117f   :  { %864 = vrot.lane.b32.xlu1 %v862_v32, %s1630_s3  ;;  %v979_v32 = vmul.f32 0.5, %v1875_v12 }
0x11f1   :  { %v865_v34 = vpop.permute.xlu1 %864 }
0x11f2   :  { %v1884_v21 = vadd.f32 %v865_v34, %v857_v33 }
0x11f4   :  { %1569 = vtanh.f32 %v1884_v21 }
0x1201   :  { %v1570_v35 = vpop.eup %1569 }
0x1202   :  { %870 = vrot.lane.b32.xlu0 %v1570_v35, %s1629_s25 }
0x1274   :  { %v871_v36 = vpop.permute.xlu0 %870 }
0x1275   :  { %v873_v37 = vmul.f32 %v1568_v30, %v871_v36 }
0x1277   :  { %875 = vrot.lane.b32.xlu1 %v873_v37, %s1630_s3  ;;  %v988_v20 = vmul.f32 0.70710677, %v873_v37  ;;  %v980_v11 = vmul.f32 0.5, %v873_v37 }
0x12e9   :  { %v876_v39 = vpop.permute.xlu1 %875 }
0x12ea   :  { %1481 = vmatmul.mubr.msk.f32.vlgmr.msra.gmra.mxu1 %vm42_vm0, %v876_v39 }
0x13aa   :  { %v945_v41 = vpop.f32.mrf.mxu1 }
0x13ab   :  { %v949_v42 = vadd.f32 %v945_v41, %v169_v40 }
0x13ac   :  { %v1482_v44 = vpop.f32.mrf.mxu1 }
0x13ad   :  { %1571 = vtanh.f32 %v949_v42  ;;  %v1301_v46 = vmul.f32 -1.442695, %v949_v42 }
0x13af   :  { %1573 = vpow2.f32 %v1301_v46  ;;  %v1944_v46 = vld [vmem:[%s2029_s5] ss:$0 sm:$0xff] }
0x13b0   :  { %1575 = verf.f32 %v982_v48 }
0x13ba   :  { %v1572_v45 = vpop.eup %1571 }
0x13bb   :  { %959 = vrot.lane.b32.xlu0 %v1572_v45, %s1629_s25 }
0x13bc   :  { %v1574_v47 = vpop.eup %1573 }
0x13bd   :  { %v953_v49 = vadd.f32 1.0, %v1574_v47  ;;  %v1576_v51 = vpop.eup %1575 }
0x13be   :  { %v998_v55 = vadd.f32 1.0, %v1576_v51 }
0x13bf   :  { %1577 = vrcp.f32 %v953_v49 }
0x13c0   :  { %1579 = verf.f32 %v984_v50  ;;  %v1006_v16 = vmul.f32 %v998_v55, %v974_v57 }
0x13c1   :  { %1581 = verf.f32 %v986_v18 }
0x13c2   :  { %1583 = verf.f32 %v988_v20 }
0x13c3   :  { %1585 = verf.f32 %v983_v61 }
0x13c4   :  { %1587 = verf.f32 %v985_v13 }
0x13cc   :  { %v1896_v52 = vpop.eup %1577 }
0x13cd   :  { %v1580_v56 = vpop.eup %1579  ;;  %v957_v5 = vmul.f32 %v1896_v52, %v1884_v21 }
0x13ce   :  { %v1000_v59 = vadd.f32 1.0, %v1580_v56  ;;  %v1582_v60 = vpop.eup %1581 }
0x13cf   :  { %v1002_v0 = vadd.f32 1.0, %v1582_v60  ;;  %v1584_v6 = vpop.eup %1583 }
0x13d0   :  { %v1008_v63 = vmul.f32 %v1000_v59, %v976_v62  ;;  %v1004_v3 = vadd.f32 1.0, %v1584_v6  ;;  %v1586_v17 = vpop.eup %1585 }
0x13d1   :  { %v1010_v2 = vmul.f32 %v1002_v0, %v978_v1  ;;  %v1588_v19 = vpop.eup %1587  ;;  %v999_v22 = vadd.f32 1.0, %v1586_v17 }
0x13d2   :  { %v1012_v38 = vmul.f32 %v1004_v3, %v980_v11  ;;  %v1001_v27 = vadd.f32 1.0, %v1588_v19 }
0x13d3   :  { %v1007_v26 = vmul.f32 %v999_v22, %v975_v25 }
0x13d4   :  { %v1009_v30 = vmul.f32 %v1001_v27, %v977_v29 }
0x142d   :  { %v960_v53 = vpop.permute.xlu0 %959 }
0x142e   :  { %v962_v54 = vmul.f32 %v1896_v52, %v960_v53 }
0x1430   :  { %964 = vrot.lane.b32.xlu1 %v962_v54, %s1630_s3 }
0x1434   :  { %1033 = vrot.lane.b32.xlu1 %v1006_v16, %s1630_s3 }
0x1438   :  { %1037 = vrot.lane.b32.xlu1 %v1008_v63, %s1630_s3 }
0x143c   :  { %1041 = vrot.lane.b32.xlu1 %v1010_v2, %s1630_s3 }
0x1440   :  { %1045 = vrot.lane.b32.xlu1 %v1012_v38, %s1630_s3 }
0x14a2   :  { %v965_v8 = vpop.permute.xlu1 %964 }
0x14a3   :  { %v967_v14 = vadd.f32 %v965_v8, %v957_v5 }
0x14a5   :  { %1589 = vtanh.f32 %v967_v14 }
0x14a6   :  { %v1034_v9 = vpop.permute.xlu1 %1033  ;;  %1591 = verf.f32 %v987_v7 }
0x14a7   :  { %1491 = vmatprep.mubr.msk.f32.mxu0 %vm42_vm0, %v1034_v9 }
0x14aa   :  { %v1038_v58 = vpop.permute.xlu1 %1037 }
0x14ae   :  { %v1042_v43 = vpop.permute.xlu1 %1041 }
0x14b2   :  { %v1590_v23 = vpop.eup %1589  ;;  %v1046_v39 = vpop.permute.xlu1 %1045 }
0x14b3   :  { %970 = vrot.lane.b32.xlu0 %v1590_v23, %s1629_s25  ;;  %v1592_v28 = vpop.eup %1591 }
0x14b4   :  { %v1003_v31 = vadd.f32 1.0, %v1592_v28 }
0x14b6   :  { %v1011_v33 = vmul.f32 %v1003_v31, %v979_v32 }
0x14b7   :  { %1035 = vrot.lane.b32.xlu0 %v1007_v26, %s1630_s3 }
0x14bb   :  { %1039 = vrot.lane.b32.xlu0 %v1009_v30, %s1630_s3 }
0x14bf   :  { %1043 = vrot.lane.b32.xlu0 %v1011_v33, %s1630_s3 }
0x1525   :  { %v971_v34 = vpop.permute.xlu0 %970 }
0x1526   :  { %v973_v21 = vmul.f32 %v1896_v52, %v971_v34 }
0x1528   :  { %v989_v35 = vmul.f32 0.70710677, %v973_v21  ;;  %v981_v41 = vmul.f32 0.5, %v973_v21 }
0x1529   :  { %v1036_v36 = vpop.permute.xlu0 %1035 }
0x152a   :  { %1593 = verf.f32 %v989_v35  ;;  %1492 = vmatmul.mubr.msk.f32.vlgmr.msra.gmra.mxu0 %vm42_vm0, %v1036_v36 }
0x152b   :  { %1494 = vmatprep.mubr.msk.f32.mxu0 %vm42_vm0, %v1038_v58 }
0x152d   :  { %v1040_v37 = vpop.permute.xlu0 %1039 }
0x152e   :  { %1495 = vmatmul.mubr.msk.f32.gmra.mxu0 %vm42_vm0, %v1040_v37 }
0x152f   :  { %1497 = vmatprep.mubr.msk.f32.mxu0 %vm42_vm0, %v1042_v43 }
0x1531   :  { %v1044_v12 = vpop.permute.xlu0 %1043 }
0x1532   :  { %1498 = vmatmul.mubr.msk.f32.gmra.mxu0 %vm42_vm0, %v1044_v12 }
0x1533   :  { %1500 = vmatprep.mubr.msk.f32.mxu0 %vm42_vm0, %v1046_v39 }
0x1537   :  { %v1594_v40 = vpop.eup %1593 }
0x1538   :  { %v1005_v42 = vadd.f32 1.0, %v1594_v40 }
0x153a   :  { %v1013_v44 = vmul.f32 %v1005_v42, %v981_v41 }
0x153c   :  { %1047 = vrot.lane.b32.xlu0 %v1013_v44, %s1630_s3 }
0x15ae   :  { %v1048_v45 = vpop.permute.xlu0 %1047 }
0x15af   :  { %1501 = vmatmul.mubr.msk.f32.gmra.mxu0 %vm42_vm0, %v1048_v45 }
0x15ea   :  { %v1493_v47 = vpop.f32.mrf.mxu0 }
0x15eb   :  { %v1137_v48 = vadd.f32 %v1493_v47, %v1944_v46 }
0x15ec   :  { %v1131_v49 = vpop.f32.mrf.mxu0 }
0x15ed   :  { %v1179_v50 = vmul.f32 0.70710677, %v1137_v48  ;;  %v1132_v18 = vadd.f32 %v1944_v46, %v1131_v49  ;;  %v1171_v6 = vmul.f32 0.5, %v1137_v48 }
0x15ee   :  { %v1496_v20 = vpop.f32.mrf.mxu0 }
0x15ef   :  { %1595 = verf.f32 %v1179_v50  ;;  %v1178_v51 = vmul.f32 0.70710677, %v1132_v18  ;;  %v1147_v52 = vadd.f32 %v1496_v20, %v1944_v46  ;;  %v1170_v3 = vmul.f32 0.5, %v1132_v18 }
0x15f0   :  { %v1141_v53 = vpop.f32.mrf.mxu0 }
0x15f1   :  { %1597 = verf.f32 %v1178_v51  ;;  %v1181_v54 = vmul.f32 0.70710677, %v1147_v52  ;;  %v1142_v55 = vadd.f32 %v1944_v46, %v1141_v53  ;;  %v1173_v4 = vmul.f32 0.5, %v1147_v52 }
0x15f2   :  { %v1499_v56 = vpop.f32.mrf.mxu0 }
0x15f3   :  { %1599 = verf.f32 %v1181_v54  ;;  %v1180_v57 = vmul.f32 0.70710677, %v1142_v55  ;;  %v1157_v16 = vadd.f32 %v1499_v56, %v1944_v46  ;;  %v1172_v14 = vmul.f32 0.5, %v1142_v55 }
0x15f4   :  { %v1151_v59 = vpop.f32.mrf.mxu0 }
0x15f5   :  { %1601 = verf.f32 %v1180_v57  ;;  %v1183_v60 = vmul.f32 0.70710677, %v1157_v16  ;;  %v1152_v62 = vadd.f32 %v1944_v46, %v1151_v59  ;;  %v1175_v19 = vmul.f32 0.5, %v1157_v16 }
0x15f7   :  { %1603 = verf.f32 %v1183_v60  ;;  %v1182_v63 = vmul.f32 0.70710677, %v1152_v62  ;;  %v1174_v28 = vmul.f32 0.5, %v1152_v62 }
0x15f9   :  { %1605 = verf.f32 %v1182_v63 }
0x15fc   :  { %v1596_v0 = vpop.eup %1595 }
0x15fd   :  { %v1195_v1 = vadd.f32 1.0, %v1596_v0 }
0x15fe   :  { %v1598_v2 = vpop.eup %1597 }
0x15ff   :  { %v1952_v11 = vmul.f32 %v1195_v1, %v1171_v6  ;;  %v1194_v38 = vadd.f32 1.0, %v1598_v2 }
0x1600   :  { %v1600_v24 = vpop.eup %1599 }
0x1601   :  { %v1211_v61 = vmul.f32 %v1952_v11, %v1952_v11  ;;  %v1956_v13 = vmul.f32 %v1194_v38, %v1170_v3  ;;  %v1197_v5 = vadd.f32 1.0, %v1600_v24 }
0x1602   :  { %v1602_v8 = vpop.eup %1601 }
0x1603   :  { %v1221_v7 = vsel %vm42_vm0, %v1211_v61, 0.0  ;;  %v1210_v15 = vmul.f32 %v1956_v13, %v1956_v13  ;;  %v1961_v9 = vmul.f32 %v1197_v5, %v1173_v4  ;;  %v1196_v10 = vadd.f32 1.0, %v1602_v8 }
0x1604   :  { %v1604_v17 = vpop.eup %1603  ;;  %1222 = vadd.xlane.f32.xlu0 %v1221_v7 }
0x1605   :  { %v1218_v22 = vsel %vm42_vm0, %v1210_v15, 0.0  ;;  %v1213_v23 = vmul.f32 %v1961_v9, %v1961_v9  ;;  %v1966_v25 = vmul.f32 %v1196_v10, %v1172_v14  ;;  %v1199_v26 = vadd.f32 1.0, %v1604_v17 }
0x1606   :  { %v1606_v27 = vpop.eup %1605  ;;  %1219 = vadd.xlane.f32.xlu1 %v1218_v22 }
0x1607   :  { %v1212_v29 = vmul.f32 %v1966_v25, %v1966_v25  ;;  %v1970_v30 = vmul.f32 %v1199_v26, %v1175_v19  ;;  %v1198_v31 = vadd.f32 1.0, %v1606_v27  ;;  %v1227_v32 = vsel %vm42_vm0, %v1213_v23, 0.0 }
0x1609   :  { %v1224_v33 = vsel %vm42_vm0, %v1212_v29, 0.0  ;;  %v1215_v34 = vmul.f32 %v1970_v30, %v1970_v30  ;;  %v1976_v58 = vmul.f32 %v1198_v31, %v1174_v28 }
0x160a   :  { %1228 = vadd.xlane.f32.xlu1 %v1227_v32  ;;  %1225 = vadd.xlane.f32.xlu0 %v1224_v33 }
0x160b   :  { %v1214_v21 = vmul.f32 %v1976_v58, %v1976_v58  ;;  %v1233_v35 = vsel %vm42_vm0, %v1215_v34, 0.0 }
0x160d   :  { %v1230_v36 = vsel %vm42_vm0, %v1214_v21, 0.0 }
0x160e   :  { %1234 = vadd.xlane.f32.xlu1 %v1233_v35  ;;  %1231 = vadd.xlane.f32.xlu0 %v1230_v36 }
0x166f   :  { %v1502_v43 = vpop.f32.mrf.mxu0 }
0x1670   :  { %v1167_v37 = vadd.f32 %v1502_v43, %v1944_v46 }
0x1671   :  { %v1161_v12 = vpop.f32.mrf.mxu0 }
0x1672   :  { %v1185_v39 = vmul.f32 0.70710677, %v1167_v37  ;;  %v1162_v40 = vadd.f32 %v1944_v46, %v1161_v12  ;;  %v1177_v44 = vmul.f32 0.5, %v1167_v37 }
0x1674   :  { %1607 = verf.f32 %v1185_v39  ;;  %v1184_v41 = vmul.f32 0.70710677, %v1162_v40  ;;  %v1176_v48 = vmul.f32 0.5, %v1162_v40 }
0x1676   :  { %1609 = verf.f32 %v1184_v41 }
0x1681   :  { %v1608_v42 = vpop.eup %1607 }
0x1682   :  { %v1201_v45 = vadd.f32 1.0, %v1608_v42 }
0x1683   :  { %v1610_v47 = vpop.eup %1609 }
0x1684   :  { %v1209_v49 = vmul.f32 %v1201_v45, %v1177_v44  ;;  %v1200_v50 = vadd.f32 1.0, %v1610_v47 }
0x1686   :  { %v1217_v18 = vmul.f32 %v1209_v49, %v1209_v49  ;;  %v1208_v20 = vmul.f32 %v1200_v50, %v1176_v48 }
0x1688   :  { %v1239_v51 = vsel %vm42_vm0, %v1217_v18, 0.0  ;;  %v1216_v52 = vmul.f32 %v1208_v20, %v1208_v20 }
0x1689   :  { %1240 = vadd.xlane.f32.xlu1 %v1239_v51 }
0x168a   :  { %v1236_v53 = vsel %vm42_vm0, %v1216_v52, 0.0 }
0x168b   :  { %1237 = vadd.xlane.f32.xlu0 %v1236_v53 }
0x168d   :  { %v1223_v46 = vpop.xlane.xlu0 %1222 }
0x168e   :  { %v1243_v54 = vmax.f32 %v1223_v46, 1e-24 }
0x168f   :  { %v1220_v55 = vpop.xlane.xlu1 %1219 }
0x1690   :  { %1611 = vrsqrt.f32 %v1243_v54  ;;  %v1242_v56 = vmax.f32 %v1220_v55, 1e-24 }
0x1692   :  { %1613 = vrsqrt.f32 %v1242_v56 }
0x1693   :  { %v1226_v57 = vpop.xlane.xlu0 %1225  ;;  %v1229_v16 = vpop.xlane.xlu1 %1228 }
0x1694   :  { %v1244_v59 = vmax.f32 %v1226_v57, 1e-24  ;;  %v1245_v60 = vmax.f32 %v1229_v16, 1e-24 }
0x1696   :  { %1615 = vrsqrt.f32 %v1244_v59 }
0x1697   :  { %1617 = vrsqrt.f32 %v1245_v60  ;;  %v1232_v62 = vpop.xlane.xlu0 %1231  ;;  %v1235_v63 = vpop.xlane.xlu1 %1234 }
0x1698   :  { %v1246_v0 = vmax.f32 %v1232_v62, 1e-24  ;;  %v1247_v6 = vmax.f32 %v1235_v63, 1e-24 }
0x169a   :  { %1619 = vrsqrt.f32 %v1246_v0 }
0x169b   :  { %1621 = vrsqrt.f32 %v1247_v6 }
0x169d   :  { %v1612_v1 = vpop.eup %1611 }
0x169e   :  { %v1259_v2 = vmul.f32 %v1612_v1, %v1952_v11 }
0x169f   :  { %v1614_v3 = vpop.eup %1613 }
0x16a0   :  { %1267 = vst.msk [vmem:[%s2030_s6 + $0x8] sm:$0xff] %vm42_vm0, %v1259_v2  ;;  %v1258_v38 = vmul.f32 %v1614_v3, %v1956_v13 }
0x16a2   :  { %1266 = vst.msk [vmem:[%s2030_s6] sm:$0xff] %vm42_vm0, %v1258_v38 }
0x16a3   :  { %v1616_v24 = vpop.eup %1615 }
0x16a4   :  { %v1618_v4 = vpop.eup %1617  ;;  %v1260_v61 = vmul.f32 %v1616_v24, %v1966_v25 }
0x16a5   :  { %v1261_v5 = vmul.f32 %v1618_v4, %v1961_v9 }
0x16a6   :  { %1268 = vst.msk [vmem:[%s2030_s6 + $0x10] sm:$0xff] %vm42_vm0, %v1260_v61 }
0x16a7   :  { %v1620_v11 = vpop.eup %1619  ;;  %1269 = vst.msk [vmem:[%s2030_s6 + $0x18] sm:$0xff] %vm42_vm0, %v1261_v5 }
0x16a8   :  { %v1622_v13 = vpop.eup %1621  ;;  %v1262_v8 = vmul.f32 %v1620_v11, %v1976_v58 }
0x16a9   :  { %v1263_v14 = vmul.f32 %v1622_v13, %v1970_v30 }
0x16aa   :  { %1270 = vst.msk [vmem:[%s2030_s6 + $0x20] sm:$0xff] %vm42_vm0, %v1262_v8 }
0x16ab   :  { %1271 = vst.msk [vmem:[%s2030_s6 + $0x28] sm:$0xff] %vm42_vm0, %v1263_v14 }
0x1712   :  { %v1241_v7 = vpop.xlane.xlu1 %1240 }
0x1713   :  { %v1249_v15 = vmax.f32 %v1241_v7, 1e-24 }
0x1714   :  { %v1238_v9 = vpop.xlane.xlu0 %1237 }
0x1715   :  { %1623 = vrsqrt.f32 %v1249_v15  ;;  %v1248_v10 = vmax.f32 %v1238_v9, 1e-24 }
0x1717   :  { %1625 = vrsqrt.f32 %v1248_v10 }
0x1722   :  { %v1624_v17 = vpop.eup %1623 }
0x1723   :  { %v1265_v19 = vmul.f32 %v1624_v17, %v1209_v49 }
0x1724   :  { %v1626_v22 = vpop.eup %1625 }
0x1725   :  { %1273 = vst.msk [vmem:[%s2030_s6 + $0x38] sm:$0xff] %vm42_vm0, %v1265_v19  ;;  %v1264_v23 = vmul.f32 %v1626_v22, %v1208_v20 }
0x1727   :  { %1272 = vst.msk [vmem:[%s2030_s6 + $0x30] sm:$0xff] %vm42_vm0, %v1264_v23 }

</bundles_post_ra>
